<compile_context>
chip_gen: v6e
topology: v6e:2x2x1
jax: 0.10.0
libtpu: 0.0.40
codegen_flags: <defaults>
</compile_context>

<pallas_src>
import jax
import jax.numpy as jnp
from jax.experimental import pallas as pl
from jax.experimental.pallas import tpu as pltpu


def _round_up(x, m):
    return ((x + m - 1) // m) * m


def _cdiv(a, b):
    return (a + b - 1) // b


def _pad_to(x, shape):
    pads = [(0, t - s) for s, t in zip(x.shape, shape)]
    if any(p[1] for p in pads):
        x = jnp.pad(x, pads)
    return x


def reward_kernel(emb_ref, img_ref,
                  wt_ref, bt_ref, wft_ref, wfi_ref, bf_ref,
                  wfc_ref, bfc_ref,
                  out_ref, acc_ref):
    """Grid = (B_tiles, S_tiles); S is the reduction axis (last, 'arbitrary')."""
    s = pl.program_id(1)

    @pl.when(s == 0)
    def _init():
        acc_ref[...] = jnp.zeros_like(acc_ref)

    # --- streaming phase: sum of pre-weighted bf16 rows over this S tile ------
    # (mean-normalised mask weights were folded into emb by the wrapper, so this
    #  is just upcast + add: ~2 VPU ops / element.)
    acc_ref[...] += jnp.sum(emb_ref[...].astype(jnp.float32), axis=1)   # [Bt, H]

    # --- finalize phase: matmuls + activations, lane-dense output store -------
    @pl.when(s == pl.num_programs(1) - 1)
    def _finalize():
        pooled = acc_ref[...]                                           # [Bt, H] f32
        # synthetic text reward head: Linear(H, H) + tanh   (bf16 MXU, f32 acc)
        text_reward = jnp.tanh(
            jnp.dot(pooled.astype(jnp.bfloat16), wt_ref[...],
                    preferred_element_type=jnp.float32) + bt_ref[...])  # [Bt, H]
        # fusion Linear(2H, H) as two bf16 dots (no lane-axis concat)
        h = (jnp.dot(text_reward.astype(jnp.bfloat16), wft_ref[...],
                     preferred_element_type=jnp.float32)
             + jnp.dot(img_ref[...], wfi_ref[...],
                       preferred_element_type=jnp.float32)
             + bf_ref[...])                                             # [Bt, H]
        h = jnp.maximum(h, 0.0)
        # fc Linear(H, 1): f32 VPU multiply + lane reduce (no N=1 MXU matmul)
        r = jnp.sum(h * wfc_ref[...], axis=-1, keepdims=True) + bfc_ref[0, 0]
        out_ref[...] = jnp.broadcast_to(r, out_ref.shape)               # [Bt, 128]


def _pick_tiles(B, S, H, tile_b, tile_s):
    """Per-generation tile / VMEM-limit selection."""
    try:
        kind = jax.devices()[0].device_kind.lower()
    except Exception:  # pragma: no cover
        kind = ""
    is_v7x = "v7" in kind
    per_buf_bytes = (12 if is_v7x else 24) * 1024 * 1024   # emb bytes per buffer
    vmem_limit = (56 if is_v7x else 100) * 1024 * 1024

    B8 = _round_up(B, 8)
    S8 = _round_up(S, 8)

    if tile_b is None:
        tile_b = min(32, B8)
        if is_v7x and B8 >= 16:
            # keep >= 2 B tiles so the 'parallel' axis feeds both TensorCores
            tile_b = min(tile_b, max(8, (B8 // 2) // 8 * 8))
    tile_b = min(_round_up(tile_b, 8), B8)
    n_b = _cdiv(B8, tile_b)
    tile_b = _round_up(_cdiv(B8, n_b), 8)        # tighten -> minimal B padding
    n_b = _cdiv(B8, tile_b)
    Bp = n_b * tile_b

    if tile_s is None:
        budget = max(128, per_buf_bytes // (tile_b * H * 2))   # bf16 tokens/tile
        tile_s = S8 if budget >= S8 else _cdiv(S8, _cdiv(S8, budget))
    tile_s = min(_round_up(tile_s, 8), S8)
    n_s = _cdiv(S8, tile_s)
    tile_s = _round_up(_cdiv(S8, n_s), 8)        # tighten -> minimal S padding
    n_s = _cdiv(S8, tile_s)
    Sp = n_s * tile_s

    return tile_b, tile_s, Bp, Sp, vmem_limit


def multimodal_reward(input_ids, attention_mask, image_features, params,
                      *, tile_b=None, tile_s=None):
    """Wrapper: weighted bf16 gather (glue, fused by XLA) + gridded pallas_call."""
    H = params["embedding"].shape[1]
    B, S = input_ids.shape

    # Masked-mean weights, folded into the gathered rows (the multiply fuses into
    # the XLA gather fusion that already writes [B,S,H] once -- no extra traffic).
    mask = attention_mask.astype(jnp.float32)                          # [B, S]
    w = mask / jnp.maximum(jnp.sum(mask, axis=1, keepdims=True), 1.0)  # [B, S]
    emb = params["embedding"].astype(jnp.bfloat16)[input_ids]          # [B, S, H]
    emb = (emb.astype(jnp.float32) * w[:, :, None]).astype(jnp.bfloat16)

    img = image_features.astype(jnp.bfloat16)                          # [B, H]

    # Resident head weights in bf16; small biases stay f32 for accuracy.
    w_text = params["w_text"].astype(jnp.bfloat16)                     # [H, H]
    w_fuse_text = params["w_fuse"][:H].astype(jnp.bfloat16)            # [H, H]
    w_fuse_img = params["w_fuse"][H:].astype(jnp.bfloat16)             # [H, H]
    b_text = params["b_text"].reshape(1, H).astype(jnp.float32)
    b_fuse = params["b_fuse"].reshape(1, H).astype(jnp.float32)
    w_fc_row = params["w_fc"].reshape(1, H).astype(jnp.float32)
    b_fc = params["b_fc"].reshape(1, 1).astype(jnp.float32)            # -> SMEM

    tile_b, tile_s, Bp, Sp, vmem_limit = _pick_tiles(B, S, H, tile_b, tile_s)

    emb = _pad_to(emb, (Bp, Sp, H))
    img = _pad_to(img, (Bp, H))

    grid = (Bp // tile_b, Sp // tile_s)
    const = lambda b, s: (0, 0)            # weights/biases resident across grid
    resident = dict(pipeline_mode=pl.Buffered(1))   # never changes -> 1 buffer

    grid_spec = pltpu.PrefetchScalarGridSpec(
        num_scalar_prefetch=0,
        grid=grid,
        in_specs=[
            pl.BlockSpec((tile_b, tile_s, H), lambda b, s: (b, s, 0)),  # emb (bf16)
            pl.BlockSpec((tile_b, H), lambda b, s: (b, 0)),             # image feats
            pl.BlockSpec((H, H), const, **resident),                    # w_text
            pl.BlockSpec((1, H), const, **resident),                    # b_text
            pl.BlockSpec((H, H), const, **resident),                    # w_fuse_text
            pl.BlockSpec((H, H), const, **resident),                    # w_fuse_img
            pl.BlockSpec((1, H), const, **resident),                    # b_fuse
            pl.BlockSpec((1, H), const, **resident),                    # w_fc row
            pl.BlockSpec(memory_space=pltpu.MemorySpace.SMEM),          # b_fc scalar
        ],
        out_specs=pl.BlockSpec((tile_b, 128), lambda b, s: (b, 0)),
        scratch_shapes=[pltpu.VMEM((tile_b, H), jnp.float32)],
    )

    reward = pl.pallas_call(
        reward_kernel,
        out_shape=jax.ShapeDtypeStruct((Bp, 128), jnp.float32),
        grid_spec=grid_spec,
        compiler_params=pltpu.CompilerParams(
            dimension_semantics=("parallel", "arbitrary"),
            vmem_limit_bytes=vmem_limit,
        ),
    )(emb, img, w_text, b_text, w_fuse_text, w_fuse_img, b_fuse, w_fc_row, b_fc)

    return reward[:B, 0]                   # == reward.squeeze(1) -> shape [B]


def _reference(input_ids, attention_mask, image_features, params):
    """Pure-JAX reference mirroring the kernel's bf16/f32 numerics."""
    H = params["embedding"].shape[1]
    mask = attention_mask.astype(jnp.float32)
    w = mask / jnp.maximum(jnp.sum(mask, axis=1, keepdims=True), 1.0)
    emb = params["embedding"].astype(jnp.bfloat16)[input_ids].astype(jnp.float32)
    emb = (emb * w[:, :, None]).astype(jnp.bfloat16).astype(jnp.float32)
    pooled = jnp.sum(emb, axis=1)
    text = jnp.tanh(
        jnp.dot(pooled.astype(jnp.bfloat16),
                params["w_text"].astype(jnp.bfloat16),
                preferred_element_type=jnp.float32)
        + params["b_text"].reshape(1, H))
    h = (jnp.dot(text.astype(jnp.bfloat16),
                 params["w_fuse"][:H].astype(jnp.bfloat16),
                 preferred_element_type=jnp.float32)
         + jnp.dot(image_features.astype(jnp.bfloat16),
                   params["w_fuse"][H:].astype(jnp.bfloat16),
                   preferred_element_type=jnp.float32)
         + params["b_fuse"].reshape(1, H))
    h = jnp.maximum(h, 0.0)
    return jnp.sum(h * params["w_fc"].reshape(1, H), axis=-1) + params["b_fc"][0]


if __name__ == "__main__":
    # Small shapes consistent with the module (hidden_size scaled 768 -> 32).
    # B and S deliberately not multiples of 8 to exercise padding.
    B, S, H, VOCAB = 6, 12, 32, 64

    key = jax.random.PRNGKey(0)
    k = jax.random.split(key, 8)

    params = {
        "embedding": jax.random.normal(k[0], (VOCAB, H), jnp.float32) * 0.1,
        "w_text":    jax.random.normal(k[1], (H, H), jnp.float32) * 0.1,
        "b_text":    jax.random.normal(k[2], (H,), jnp.float32) * 0.1,
        "w_fuse":    jax.random.normal(k[3], (2 * H, H), jnp.float32) * 0.1,
        "b_fuse":    jax.random.normal(k[4], (H,), jnp.float32) * 0.1,
        "w_fc":      jax.random.normal(k[5], (H, 1), jnp.float32) * 0.1,
        "b_fc":      jnp.array([0.05], jnp.float32),
    }

    input_ids = jax.random.randint(k[6], (B, S), 0, VOCAB, jnp.int32)
    lengths = jax.random.randint(k[7], (B,), 3, S + 1, jnp.int32)
    attention_mask = (jnp.arange(S)[None, :] < lengths[:, None]).astype(jnp.int32)
    image_features = jax.random.normal(key, (B, H), jnp.float32)

    ref = _reference(input_ids, attention_mask, image_features, params)

    # 1) forced small S tile -> two S grid steps (exercises init/accumulate/finalize)
    out = multimodal_reward(input_ids, attention_mask, image_features, params,
                            tile_b=8, tile_s=8)
    out = jax.block_until_ready(out)
    assert out.shape == (B,)
    assert jnp.allclose(out, ref, atol=5e-3, rtol=2e-2), (out, ref)

    # 2) auto (per-generation) tiling path
    out2 = multimodal_reward(input_ids, attention_mask, image_features, params)
    out2 = jax.block_until_ready(out2)
    assert jnp.allclose(out2, ref, atol=5e-3, rtol=2e-2), (out2, ref)

    print("KERNEL_OK")
</pallas_src>

<mosaic_0001>
module attributes {stable_mosaic.version = 11 : i64} {
  func.func @reward_kernel(%arg0: i32, %arg1: i32, %arg2: memref<8x8x32xbf16, #tpu.memory_space<vmem>>, %arg3: memref<8x32xbf16, #tpu.memory_space<vmem>>, %arg4: memref<32x32xbf16, #tpu.memory_space<vmem>>, %arg5: memref<1x32xf32, #tpu.memory_space<vmem>>, %arg6: memref<32x32xbf16, #tpu.memory_space<vmem>>, %arg7: memref<32x32xbf16, #tpu.memory_space<vmem>>, %arg8: memref<1x32xf32, #tpu.memory_space<vmem>>, %arg9: memref<1x32xf32, #tpu.memory_space<vmem>>, %arg10: memref<1x1xf32, #tpu.memory_space<smem>>, %arg11: memref<8x128xf32, #tpu.memory_space<vmem>>, %arg12: memref<8x32xf32, #tpu.memory_space<vmem>>) attributes {dimension_semantics = [#tpu.dimension_semantics<parallel>, #tpu.dimension_semantics<arbitrary>], iteration_bounds = array<i64: 1, 2>, scalar_prefetch = 0 : i64, scratch_operands = 1 : i64, tpu.core_type = #tpu.core_type<tc>, window_params = [{transform_indices = @transform_0, window_bounds = array<i64: 8, 8, 32>}, {transform_indices = @transform_1, window_bounds = array<i64: 8, 32>}, {pipeline_mode = #tpu.pipeline_mode<synchronous>, transform_indices = @transform_2, window_bounds = array<i64: 32, 32>}, {pipeline_mode = #tpu.pipeline_mode<synchronous>, transform_indices = @transform_3, window_bounds = array<i64: 1, 32>}, {pipeline_mode = #tpu.pipeline_mode<synchronous>, transform_indices = @transform_4, window_bounds = array<i64: 32, 32>}, {pipeline_mode = #tpu.pipeline_mode<synchronous>, transform_indices = @transform_5, window_bounds = array<i64: 32, 32>}, {pipeline_mode = #tpu.pipeline_mode<synchronous>, transform_indices = @transform_6, window_bounds = array<i64: 1, 32>}, {pipeline_mode = #tpu.pipeline_mode<synchronous>, transform_indices = @transform_7, window_bounds = array<i64: 1, 32>}, {transform_indices = @transform_8, window_bounds = array<i64: 1, 1>}, {transform_indices = @transform_9, window_bounds = array<i64: 8, 128>}]} {
    %c0_i32 = arith.constant 0 : i32
    %0 = arith.cmpi eq, %arg1, %c0_i32 : i32
    %1 = arith.extui %0 : i1 to i32
    %c0_i32_0 = arith.constant 0 : i32
    %2 = arith.cmpi ne, %1, %c0_i32_0 : i32
    scf.if %2 {
      %cst_8 = arith.constant 0.000000e+00 : f32
      %12 = vector.broadcast %cst_8 : f32 to vector<8x32xf32>
      %c0_9 = arith.constant 0 : index
      %c0_10 = arith.constant 0 : index
      %13 = vector.load %arg12[%c0_9, %c0_10] : memref<8x32xf32, #tpu.memory_space<vmem>>, vector<8x32xf32>
      tpu.vector_store %arg12[%c0_9, %c0_10], %12 {strides = array<i32>} : memref<8x32xf32, #tpu.memory_space<vmem>>, vector<8x32xf32>,
    } else {
    }
    %c0 = arith.constant 0 : index
    %c0_1 = arith.constant 0 : index
    %3 = vector.load %arg12[%c0, %c0_1] : memref<8x32xf32, #tpu.memory_space<vmem>>, vector<8x32xf32>
    %c0_2 = arith.constant 0 : index
    %c0_3 = arith.constant 0 : index
    %c0_4 = arith.constant 0 : index
    %4 = vector.load %arg2[%c0_2, %c0_3, %c0_4] : memref<8x8x32xbf16, #tpu.memory_space<vmem>>, vector<8x8x32xbf16>
    %5 = arith.extf %4 : vector<8x8x32xbf16> to vector<8x8x32xf32>
    %cst = arith.constant dense<0.000000e+00> : vector<8x32xf32>
    %6 = vector.multi_reduction <add>, %5, %cst [1] : vector<8x8x32xf32> to vector<8x32xf32>
    %7 = arith.addf %3, %6 : vector<8x32xf32>
    %c0_5 = arith.constant 0 : index
    %c0_6 = arith.constant 0 : index
    %8 = vector.load %arg12[%c0_5, %c0_6] : memref<8x32xf32, #tpu.memory_space<vmem>>, vector<8x32xf32>
    tpu.vector_store %arg12[%c0_5, %c0_6], %7 {strides = array<i32>} : memref<8x32xf32, #tpu.memory_space<vmem>>, vector<8x32xf32>,
    %c1_i32 = arith.constant 1 : i32
    %9 = arith.cmpi eq, %arg1, %c1_i32 : i32
    %10 = arith.extui %9 : i1 to i32
    %c0_i32_7 = arith.constant 0 : i32
    %11 = arith.cmpi ne, %10, %c0_i32_7 : i32
    scf.if %11 {
      %c0_8 = arith.constant 0 : index
      %c0_9 = arith.constant 0 : index
      %12 = vector.load %arg12[%c0_8, %c0_9] : memref<8x32xf32, #tpu.memory_space<vmem>>, vector<8x32xf32>
      %13 = arith.truncf %12 : vector<8x32xf32> to vector<8x32xbf16>
      %c0_10 = arith.constant 0 : index
      %c0_11 = arith.constant 0 : index
      %14 = vector.load %arg4[%c0_10, %c0_11] : memref<32x32xbf16, #tpu.memory_space<vmem>>, vector<32x32xbf16>
      %cst_12 = arith.constant dense<0.000000e+00> : vector<8x32xf32>
      %15 = tpu.matmul %13, %14, %cst_12 {dimension_numbers = #tpu.dot_dimension_numbers<[1], [0], [0], [1], [0, 0, 1, 1], [], []>} : vector<8x32xbf16>, vector<32x32xbf16>, vector<8x32xf32> -> vector<8x32xf32>
      %c0_13 = arith.constant 0 : index
      %c0_14 = arith.constant 0 : index
      %16 = vector.load %arg5[%c0_13, %c0_14] : memref<1x32xf32, #tpu.memory_space<vmem>>, vector<1x32xf32>
      %17 = vector.broadcast %16 : vector<1x32xf32> to vector<8x32xf32>
      %18 = arith.addf %15, %17 : vector<8x32xf32>
      %19 = math.tanh %18 : vector<8x32xf32>
      %20 = arith.truncf %19 : vector<8x32xf32> to vector<8x32xbf16>
      %c0_15 = arith.constant 0 : index
      %c0_16 = arith.constant 0 : index
      %21 = vector.load %arg6[%c0_15, %c0_16] : memref<32x32xbf16, #tpu.memory_space<vmem>>, vector<32x32xbf16>
      %cst_17 = arith.constant dense<0.000000e+00> : vector<8x32xf32>
      %22 = tpu.matmul %20, %21, %cst_17 {dimension_numbers = #tpu.dot_dimension_numbers<[1], [0], [0], [1], [0, 0, 1, 1], [], []>} : vector<8x32xbf16>, vector<32x32xbf16>, vector<8x32xf32> -> vector<8x32xf32>
      %c0_18 = arith.constant 0 : index
      %c0_19 = arith.constant 0 : index
      %23 = vector.load %arg3[%c0_18, %c0_19] : memref<8x32xbf16, #tpu.memory_space<vmem>>, vector<8x32xbf16>
      %c0_20 = arith.constant 0 : index
      %c0_21 = arith.constant 0 : index
      %24 = vector.load %arg7[%c0_20, %c0_21] : memref<32x32xbf16, #tpu.memory_space<vmem>>, vector<32x32xbf16>
      %cst_22 = arith.constant dense<0.000000e+00> : vector<8x32xf32>
      %25 = tpu.matmul %23, %24, %cst_22 {dimension_numbers = #tpu.dot_dimension_numbers<[1], [0], [0], [1], [0, 0, 1, 1], [], []>} : vector<8x32xbf16>, vector<32x32xbf16>, vector<8x32xf32> -> vector<8x32xf32>
      %26 = arith.addf %22, %25 : vector<8x32xf32>
      %c0_23 = arith.constant 0 : index
      %c0_24 = arith.constant 0 : index
      %27 = vector.load %arg8[%c0_23, %c0_24] : memref<1x32xf32, #tpu.memory_space<vmem>>, vector<1x32xf32>
      %28 = vector.broadcast %27 : vector<1x32xf32> to vector<8x32xf32>
      %29 = arith.addf %26, %28 : vector<8x32xf32>
      %cst_25 = arith.constant 0.000000e+00 : f32
      %30 = vector.broadcast %cst_25 : f32 to vector<8x32xf32>
      %31 = arith.maximumf %29, %30 : vector<8x32xf32>
      %c0_26 = arith.constant 0 : index
      %c0_27 = arith.constant 0 : index
      %32 = vector.load %arg9[%c0_26, %c0_27] : memref<1x32xf32, #tpu.memory_space<vmem>>, vector<1x32xf32>
      %33 = vector.broadcast %32 : vector<1x32xf32> to vector<8x32xf32>
      %34 = arith.mulf %31, %33 : vector<8x32xf32>
      %cst_28 = arith.constant dense<0.000000e+00> : vector<8xf32>
      %35 = vector.multi_reduction <add>, %34, %cst_28 [1] : vector<8x32xf32> to vector<8xf32>
      %36 = vector.shape_cast %35 : vector<8xf32> to vector<8x1xf32>
      %c0_29 = arith.constant 0 : index
      %c0_30 = arith.constant 0 : index
      %37 = memref.load %arg10[%c0_29, %c0_30] : memref<1x1xf32, #tpu.memory_space<smem>>
      %38 = vector.broadcast %37 : f32 to vector<8x1xf32>
      %39 = arith.addf %36, %38 : vector<8x1xf32>
      %40 = vector.shape_cast %39 : vector<8x1xf32> to vector<8x1xf32>
      %41 = vector.broadcast %40 : vector<8x1xf32> to vector<8x128xf32>
      %c0_31 = arith.constant 0 : index
      %c0_32 = arith.constant 0 : index
      %42 = vector.load %arg11[%c0_31, %c0_32] : memref<8x128xf32, #tpu.memory_space<vmem>>, vector<8x128xf32>
      tpu.vector_store %arg11[%c0_31, %c0_32], %41 {strides = array<i32>} : memref<8x128xf32, #tpu.memory_space<vmem>>, vector<8x128xf32>,
    } else {
    }
    return
  }
  func.func @transform_0(%arg0: i32, %arg1: i32) -> (i32, i32, i32) {
    %c0_i32 = arith.constant 0 : i32
    %c0_i32_0 = arith.constant 0 : i32
    return %arg0, %arg1, %c0_i32 : i32, i32, i32
  }
  func.func @transform_1(%arg0: i32, %arg1: i32) -> (i32, i32) {
    %c0_i32 = arith.constant 0 : i32
    %c0_i32_0 = arith.constant 0 : i32
    return %arg0, %c0_i32 : i32, i32
  }
  func.func @transform_2(%arg0: i32, %arg1: i32) -> (i32, i32) {
    %c0_i32 = arith.constant 0 : i32
    %c0_i32_0 = arith.constant 0 : i32
    %c0_i32_1 = arith.constant 0 : i32
    return %c0_i32, %c0_i32_0 : i32, i32
  }
  func.func @transform_3(%arg0: i32, %arg1: i32) -> (i32, i32) {
    %c0_i32 = arith.constant 0 : i32
    %c0_i32_0 = arith.constant 0 : i32
    %c0_i32_1 = arith.constant 0 : i32
    return %c0_i32, %c0_i32_0 : i32, i32
  }
  func.func @transform_4(%arg0: i32, %arg1: i32) -> (i32, i32) {
    %c0_i32 = arith.constant 0 : i32
    %c0_i32_0 = arith.constant 0 : i32
    %c0_i32_1 = arith.constant 0 : i32
    return %c0_i32, %c0_i32_0 : i32, i32
  }
  func.func @transform_5(%arg0: i32, %arg1: i32) -> (i32, i32) {
    %c0_i32 = arith.constant 0 : i32
    %c0_i32_0 = arith.constant 0 : i32
    %c0_i32_1 = arith.constant 0 : i32
    return %c0_i32, %c0_i32_0 : i32, i32
  }
  func.func @transform_6(%arg0: i32, %arg1: i32) -> (i32, i32) {
    %c0_i32 = arith.constant 0 : i32
    %c0_i32_0 = arith.constant 0 : i32
    %c0_i32_1 = arith.constant 0 : i32
    return %c0_i32, %c0_i32_0 : i32, i32
  }
  func.func @transform_7(%arg0: i32, %arg1: i32) -> (i32, i32) {
    %c0_i32 = arith.constant 0 : i32
    %c0_i32_0 = arith.constant 0 : i32
    %c0_i32_1 = arith.constant 0 : i32
    return %c0_i32, %c0_i32_0 : i32, i32
  }
  func.func @transform_8(%arg0: i32, %arg1: i32) -> (i32, i32) {
    %c0_i32 = arith.constant 0 : i32
    %c0_i32_0 = arith.constant 0 : i32
    %c0_i32_1 = arith.constant 0 : i32
    return %c0_i32, %c0_i32_0 : i32, i32
  }
  func.func @transform_9(%arg0: i32, %arg1: i32) -> (i32, i32) {
    %c0_i32 = arith.constant 0 : i32
    %c0_i32_0 = arith.constant 0 : i32
    return %arg0, %c0_i32 : i32, i32
  }
}

</mosaic_0001>

<bundles_post_ra>
// kernel: tpu_custom_call.1
= control target key start
LH: loop header
LB: loop body
LE: loop exit
PB: predicated region body
PF: predicated region fallthrough
CT: control target
= control target key end

     0   :  { %s1552_s0 = inlined_call_operand.hbm [shape: bf16[8,16,32], index: 0, kind: input, shape index: {}]   ;;  %s1553_s1 = inlined_call_operand.hbm [shape: bf16[8,32], index: 1, kind: input, shape index: {}]   ;;  %s1554_s2 = inlined_call_operand.hbm [shape: bf16[32,32], index: 2, kind: input, shape index: {}]   ;;  %s1555_s3 = inlined_call_operand.vmem [shape: f32[1,32], index: 3, kind: input, shape index: {}]   ;;  %s1556_s4 = inlined_call_operand.hbm [shape: bf16[32,32], index: 4, kind: input, shape index: {}]   ;;  %s1557_s5 = inlined_call_operand.hbm [shape: bf16[32,32], index: 5, kind: input, shape index: {}]   ;;  %s1558_s6 = inlined_call_operand.vmem [shape: f32[1,32], index: 6, kind: input, shape index: {}]   ;;  %s1559_s7 = inlined_call_operand.vmem [shape: f32[1,32], index: 7, kind: input, shape index: {}]   ;;  %s1560_s8 = inlined_call_operand.<no memory space> [shape: f32[1,1], index: 8, kind: input, shape index: {}]   ;;  %s1561_s9 = inlined_call_operand.hbm [shape: f32[8,128], index: 9, kind: output, shape index: {}]  }
   0x1   :  { %1569 = sst [smem:[#allocation18_spill]] %s1552_s0 }
   0x2   :  { %1570 = sst [smem:[#allocation19_spill]] %s1553_s1 }
   0x3   :  { %14 = sst [smem:[#allocation3]] %s1560_s8 }
   0x4   :  { %15 = vsyncpa [#allocation5], 0 }
   0x5   :  { %17 = vsyncpa [#allocation5 + $0x1], 0 }
   0x6   :  { %18 = vsyncpa [#allocation8], 0 }
   0x7   :  { %19 = vsyncpa [#allocation11], 0 }
   0x8   :  { %20 = vsyncpa [#allocation6], 0  ;;  %s1347_s11 = smov 0   ;;  %s1349_s12 = smov 0  }
   0x9   :  { %s1351_s13 = smov 0   ;;  %s1353_s14 = smov 0  }
   0xa   :  { %s1355_s15 = smov 0   ;;  %s1357_s16 = smov 0  }
   0xb LB: > { %s1566_s8 = sadd.s32 4294967295, %s1280_s16   ;;  %p60_p0 = scmp.ne.s32.totalorder %s1264_s12, %s1260_s11  ;;  %s1280_s16 = sphi %s1357_s16, %s26_s16   ;;  %s1276_s15 = sphi %s1355_s15, %s1589_s15   ;;  %s1272_s14 = sphi %s1353_s14, %s1588_s14   ;;  %s1268_s13 = sphi %s1351_s13, %s1587_s13   ;;  %s1264_s12 = sphi %s1349_s12, %s1586_s12   ;;  %s1260_s11 = sphi %s1347_s11, %s1585_s11  }
   0xc   : > { %p1379_p1 = scmp.eq.s32.totalorder %s1566_s8, 0  ;;  %p861_p2 = scmp.ge.s32.totalorder %s1280_s16, 1 }
   0xd   : > { %p270_p3 = scmp.lt.s32.totalorder %s1280_s16, 3  ;;  %s1282_s20 = smov [#allocation7]  }
   0xe   : > { %s1571_s17 = scalar_select %p1379_p1, 1, 0 }
   0xf   : > { %p1387_p4 = por %p1379_p1, %p60_p0  ;;  %p1391_p5 = pnand %p861_p2, %p270_p3 }
  0x10   : > { %s285_s21 = sshll.u32 %s1282_s20, 4  ;;  %s1283_s23 = smov [#allocation10]   ;;  %s286_s21 = int_to_ptr.vmem [resolvable:$true] %s285_s21 }
  0x11   : > { %s1572_s18 = scalar_select %p1387_p4, 1, 0 }
  0x12   : > { %s1573_s19 = scalar_select %p1391_p5, 1, 0 }
  0x13   : > { %p967_p6 = pneg %p1391_p5  ;;  %s311_s24 = sshll.u32 %s1283_s23, 4  ;;  %s312_s24 = int_to_ptr.vmem [resolvable:$true] %s311_s24 }
  0x14   : > { %s1284_s25 = smov [#allocation9]   ;;  %s1073_s27 = scalar_lea.vmem %s286_s21, 64 }
  0x15   : > { %p1399_p7 = pnand %p967_p6, %p1379_p1  ;;  %s295_s26 = sshll.u32 %s1284_s25, 4  ;;  %s296_s26 = int_to_ptr.vmem [resolvable:$true] %s295_s26 }
  0x16   : > { %p1074_p9 = scmp.ne.s32.totalorder %s286_s21, %s1073_s27  ;;  %p1081_p12 = scmp.lt.s32.totalorder %s286_s21, %s286_s21 }
  0x17   : > { %p1064_p8 = pneg %p1399_p7  ;;  %p1082_p13 = scmp.lt.s32.totalorder %s1073_s27, %s1073_s27 }
  0x19   : > { %p1076_p10 = pnand %p1074_p9, %p1064_p8  ;;  %p1083_p0 = por %p1082_p13, %p1081_p12 }
  0x1b   : > { %p1077_p11 = pneg %p1076_p10 }
  0x1d   : > { %p1084_p2 = pnand %p1083_p0, %p1077_p11 }
  0x1f   : > { %1087 = shalt.err (!%p1084_p2)
}
  0x20   : > { %s1575_s1 = sld [smem:[#allocation19_spill]]  ;;  %s1099_s30 = scalar_lea.vmem %s312_s24, 256 }
  0x21   : > { %p1100_p3 = scmp.ne.s32.totalorder %s312_s24, %s1099_s30  ;;  %p1107_p9 = scmp.lt.s32.totalorder %s312_s24, %s312_s24 }
  0x22   : > { %p1108_p10 = scmp.lt.s32.totalorder %s1099_s30, %s1099_s30 }
  0x23   : > { %p1102_p6 = pnand %p1100_p3, %p1064_p8 }
  0x24   : > { %p1109_p4 = por %p1108_p10, %p1107_p9 }
  0x25   : > { %p1103_p1 = pneg %p1102_p6 }
  0x26   : > { %970 = dma.hbm_to_vmem [thread:$0]  (!%p1399_p7), %s1575_s1, 64, %s286_s21, [#allocation8]  }
  0x27   : > { %p1110_p5 = pnand %p1109_p4, %p1103_p1 }
  0x29   : > { %1113 = shalt.err (!%p1110_p5)
}
  0x2a   : > { %s1567_s10 = smov 64   ;;  %s1568_s11 = smov 4  }
  0x2b   : > { %976 = dma.hbm_to_vmem [thread:$0]  (!%p1399_p7), %s1556_s4, 256, %s312_s24, [#allocation11], %s1567_s10, %s1567_s10, %s1568_s11  }
  0x2c   : > { %s1125_s23 = scalar_lea.vmem %s296_s26, 256  ;;  %p1133_p4 = scmp.lt.s32.totalorder %s296_s26, %s296_s26 }
  0x2d   : > { %p1126_p11 = scmp.ne.s32.totalorder %s296_s26, %s1125_s23  ;;  %p1134_p5 = scmp.lt.s32.totalorder %s1125_s23, %s1125_s23 }
  0x2f   : > { %p1128_p12 = pnand %p1126_p11, %p1064_p8  ;;  %p1135_p13 = por %p1134_p5, %p1133_p4 }
  0x31   : > { %p1129_p1 = pneg %p1128_p12 }
  0x33   : > { %p1136_p0 = pnand %p1135_p13, %p1129_p1 }
  0x35   : > { %1139 = shalt.err (!%p1136_p0)
}
  0x36   : > { %973 = dma.hbm_to_vmem [thread:$0]  (!%p1399_p7), %s1554_s2, 256, %s296_s26, [#allocation8], %s1567_s10, %s1567_s10, %s1568_s11  }
  0x37   : > { %s1287_s24 = smov [#allocation12]  }
  0x38   : > { %s324_s28 = sshll.u32 %s1287_s24, 4  ;;  %s325_s28 = int_to_ptr.vmem [resolvable:$true] %s324_s28 }
  0x39   : > { %s1151_s29 = scalar_lea.vmem %s325_s28, 256  ;;  %p1159_p9 = scmp.lt.s32.totalorder %s325_s28, %s325_s28 }
  0x3a   : > { %p1152_p2 = scmp.ne.s32.totalorder %s325_s28, %s1151_s29  ;;  %p1160_p10 = scmp.lt.s32.totalorder %s1151_s29, %s1151_s29 }
  0x3c   : > { %p1154_p3 = pnand %p1152_p2, %p1064_p8  ;;  %p1161_p11 = por %p1160_p10, %p1159_p9 }
  0x3e   : > { %p1155_p6 = pneg %p1154_p3 }
  0x40   : > { %p1162_p12 = pnand %p1161_p11, %p1155_p6 }
  0x42   : > { %1165 = shalt.err (!%p1162_p12)
}
  0x43   : > { %979 = dma.hbm_to_vmem [thread:$0]  (!%p1399_p7), %s1557_s5, 256, %s325_s28, [#allocation11], %s1567_s10, %s1567_s10, %s1568_s11  }
  0x44   : > { %s35_s20 = sadd.s32 1, %s1276_s15  ;;  %s47_s21 = sadd.s32 1, %s1268_s13 }
  0x45   : > { %p36_p8 = scmp.ge.s32.totalorder %s35_s20, 2  ;;  %p54_p1 = scmp.ne.s32.totalorder %s1268_s13, %s1264_s12 }
  0x46   : > { %p55_p4 = scmp.eq.s32.totalorder %s1280_s16, 0  ;;  %p988_p5 = scmp.lt.s32.totalorder %s1280_s16, 2 }
  0x47   : > { %s1591_s20 = smov (%p36_p8, %s35_s20), 0  ;;  %s347_s22 = sand.u32 1, %s1268_s13  }
  0x48   : > { %p56_p13 = por %p55_p4, %p54_p1  ;;  %s43_s23 = ssub.s32 %s1276_s15, %s1591_s20 }
  0x49   : > { %p45_p0 = scmp.eq.s32.totalorder %s43_s23, 0  ;;  %s867_s25 = sshll.u32 %s347_s22, 5 }
  0x4a   : > { %s868_s27 = sshll.u32 %s1276_s15, 6  ;;  %s1576_s0 = sld [smem:[#allocation18_spill]] }
  0x4b   : > { %s1459_s24 = scalar_select %p45_p0, %s1268_s13, %s47_s21  }
  0x4c   : > { %s351_s30 = scalar_lea.vmem [#allocation4], %s867_s25  ;;  %p1466_p7 = pnand %p988_p5, %p56_p13 }
  0x4d   : > { %s360_s8 = sshll.u32 %s351_s30, 4  ;;  %s348_s11 = scalar_lea.sflag [#allocation5], %s347_s22  ;;  %s361_s8 = int_to_ptr.vmem [resolvable:$true] %s360_s8 }
  0x4e   : > { %p1168_p2 = pneg %p1466_p7  ;;  %s1179_s23 = scalar_lea.vmem %s361_s8, 512 }
  0x4f   : > { %p1180_p3 = scmp.ne.s32.totalorder %s361_s8, %s1179_s23  ;;  %s1288_s21 = smov [#allocation4]  }
  0x50   : > { %s359_s26 = scalar_lea.hbm %s1576_s0, %s868_s27  ;;  %s1184_s1 = sshll.u32 %s1288_s21, 4  ;;  %s1185_s1 = int_to_ptr.vmem [resolvable:$false] %s1184_s1 }
  0x51   : > { %p1182_p6 = pnand %p1180_p3, %p1168_p2  ;;  %s1186_s27 = scalar_lea.vmem %s1185_s1, 1024 }
  0x52   : > { %p1187_p10 = scmp.lt.s32.totalorder %s361_s8, %s1185_s1  ;;  %p1188_p11 = scmp.lt.s32.totalorder %s1186_s27, %s1179_s23 }
  0x53   : > { %p1183_p9 = pneg %p1182_p6 }
  0x54   : > { %p1189_p12 = por %p1188_p11, %p1187_p10 }
  0x56   : > { %p1190_p8 = pnand %p1189_p12, %p1183_p9 }
  0x58   : > { %1193 = shalt.err (!%p1190_p8)
}
  0x59   : > { %s1289_s25 = smov 128   ;;  %s1578_s29 = smov 4  }
  0x5a   : > { %s1579_s22 = smov 64   ;;  %p1580_p1 = scmp.ne.s32.totalorder %s1573_s19, 0 }
  0x5b   : > { %983 = dma.hbm_to_vmem [thread:$0]  (!%p1466_p7), %s359_s26, 512, %s361_s8, %s348_s11, %s1289_s25, %s1579_s22, %s1578_s29  }
  0x5c   : > { %372 = sbr.rel (%p1580_p1) target bundleno = 716 (0x2cc), region = 56  ;;  %s374_s28 = sand.u32 (!%p1580_p1), 1, %s1264_s12  }
  0x5d   : > { %s870_s30 = sshll.u32 (!%p1580_p1), %s374_s28, 5  ;;  %s375_s21 = scalar_lea.sflag (!%p1580_p1), [#allocation5], %s374_s28 }
  0x5e   : > { %s378_s0 = scalar_lea.vmem (!%p1580_p1), [#allocation4], %s870_s30  ;;  %p1581_p4 = scmp.ne.s32.totalorder (!%p1580_p1), %s1572_s18, 0 }
  0x61   : > { %1243 = dma.done.wait (%p1581_p4), %s375_s21, 512  }
  0x62   : > { %1245 = vsyncadd (%p1581_p4), %s375_s21, 4294966784  ;;  %p1582_p5 = scmp.ne.s32.totalorder %s1571_s17, 0 }
  0x64   : > { %1247 = dma.done.wait (%p1582_p5), [#allocation8], 320  }
  0x65   : > { %1249 = vsyncadd (%p1582_p5), [#allocation8], 4294966976 }
  0x66   : > { %1251 = dma.done.wait (%p1582_p5), [#allocation11], 512  }
  0x67   : > { %1253 = vsyncadd (%p1582_p5), [#allocation11], 4294966784  ;;  %p875_p13 = scmp.ne.s32.totalorder %s1272_s14, 0 }
  0x69   : > { %429 = sbr.rel (%p875_p13) target bundleno = 112 (0x70), region = 80 }
  0x6e   : > { %vm430_vm0 = vcmask 261120   ;;  %v1290_v0 = vmov 0.0  }
  0x6f   : > { %431 = vst.msk [vmem:[#allocation2] sm:$0xff] %vm430_vm0, %v1290_v0 }
  0x70 PF: > { %v894_v1 = vld [vmem:[%s378_s0] sm:$0xff]   ;;  %v909_v2 = vld [vmem:[%s378_s0 + $0x8] sm:$0xff]   ;;  %vm449_vm1 = vcmask 261120   ;;  %v910_v7 = vld [vmem:[%s378_s0 + $0x10] sm:$0xff]   ;;  %vm514_vm2 = vcmask 1041409   ;;  %vm516_vm3 = vcmask 1042434  }
  0x71   : > { %v895_v3 = vunpack.c.l.bf16 %v894_v1  ;;  %v896_v4 = vunpack.c.h.bf16 %v894_v1  ;;  %v899_v5 = vunpack.c.l.bf16 %v909_v2  ;;  %v900_v6 = vunpack.c.h.bf16 %v909_v2  ;;  %v911_v8 = vld [vmem:[%s378_s0 + $0x18] sm:$0xff]   ;;  %p876_p0 = scmp.ne.s32.totalorder %s1272_s14, 1 }
  0x72   : > { %v903_v9 = vunpack.c.l.bf16 %v910_v7  ;;  %v904_v10 = vunpack.c.h.bf16 %v910_v7  ;;  %v907_v11 = vunpack.c.l.bf16 %v911_v8  ;;  %v908_v12 = vunpack.c.h.bf16 %v911_v8  ;;  %s744_s19 = sld [smem:[#allocation3]] (!%p876_p0) }
  0x73   : > { %v450_v13 = vsel %vm449_vm1, %v895_v3, 0.0  ;;  %v457_v14 = vsel %vm449_vm1, %v896_v4, 0.0  ;;  %v464_v15 = vsel %vm449_vm1, %v899_v5, 0.0  ;;  %v471_v16 = vsel %vm449_vm1, %v900_v6, 0.0 }
  0x74   : > { %v451_v17 = vrot.slane %v450_v13, 4  ;;  %v458_v18 = vrot.slane %v457_v14, 4  ;;  %v465_v19 = vrot.slane %v464_v15, 4  ;;  %v472_v20 = vrot.slane %v471_v16, 4 }
  0x75   : > { %v478_v21 = vsel %vm449_vm1, %v903_v9, 0.0  ;;  %v485_v22 = vsel %vm449_vm1, %v904_v10, 0.0  ;;  %v492_v23 = vsel %vm449_vm1, %v907_v11, 0.0  ;;  %v499_v24 = vsel %vm449_vm1, %v908_v12, 0.0 }
  0x76   : > { %v452_v25 = vadd.f32 %v451_v17, %v450_v13  ;;  %v459_v26 = vadd.f32 %v458_v18, %v457_v14  ;;  %v466_v27 = vadd.f32 %v465_v19, %v464_v15  ;;  %v473_v28 = vadd.f32 %v472_v20, %v471_v16  ;;  %v432_v9 = vld [vmem:[#allocation2] sm:$0xff] }
  0x77   : > { %v479_v29 = vrot.slane %v478_v21, 4  ;;  %v486_v30 = vrot.slane %v485_v22, 4  ;;  %v493_v31 = vrot.slane %v492_v23, 4  ;;  %v500_v32 = vrot.slane %v499_v24, 4 }
  0x78   : > { %v453_v33 = vrot.slane %v452_v25, 2  ;;  %v460_v34 = vrot.slane %v459_v26, 2  ;;  %v467_v35 = vrot.slane %v466_v27, 2  ;;  %v474_v36 = vrot.slane %v473_v28, 2 }
  0x79   : > { %v480_v37 = vadd.f32 %v479_v29, %v478_v21  ;;  %v487_v38 = vadd.f32 %v486_v30, %v485_v22  ;;  %v494_v39 = vadd.f32 %v493_v31, %v492_v23  ;;  %v501_v40 = vadd.f32 %v500_v32, %v499_v24 }
  0x7a   : > { %v454_v41 = vadd.f32 %v453_v33, %v452_v25  ;;  %v461_v42 = vadd.f32 %v460_v34, %v459_v26  ;;  %v468_v43 = vadd.f32 %v467_v35, %v466_v27  ;;  %v475_v44 = vadd.f32 %v474_v36, %v473_v28 }
  0x7b   : > { %v481_v45 = vrot.slane %v480_v37, 2  ;;  %v488_v46 = vrot.slane %v487_v38, 2  ;;  %v495_v47 = vrot.slane %v494_v39, 2  ;;  %v502_v48 = vrot.slane %v501_v40, 2 }
  0x7c   : > { %v455_v49 = vrot.slane %v454_v41, 1  ;;  %v462_v50 = vrot.slane %v461_v42, 1  ;;  %v469_v51 = vrot.slane %v468_v43, 1  ;;  %v476_v52 = vrot.slane %v475_v44, 1 }
  0x7d   : > { %v482_v53 = vadd.f32 %v481_v45, %v480_v37  ;;  %v489_v54 = vadd.f32 %v488_v46, %v487_v38  ;;  %v496_v55 = vadd.f32 %v495_v47, %v494_v39  ;;  %v503_v56 = vadd.f32 %v502_v48, %v501_v40 }
  0x7e   : > { %v456_v57 = vadd.f32 %v455_v49, %v454_v41  ;;  %v463_v58 = vadd.f32 %v462_v50, %v461_v42  ;;  %v470_v59 = vadd.f32 %v469_v51, %v468_v43  ;;  %v477_v60 = vadd.f32 %v476_v52, %v475_v44 }
  0x7f   : > { %v483_v61 = vrot.slane %v482_v53, 1  ;;  %v490_v62 = vrot.slane %v489_v54, 1  ;;  %v497_v63 = vrot.slane %v496_v55, 1  ;;  %v504_v0 = vrot.slane %v503_v56, 1 }
  0x80   : > { %v515_v1 = vsel %vm514_vm2, %v463_v58, %v456_v57  ;;  %vm518_vm4 = vcmask 1043459   ;;  %vm520_vm5 = vcmask 1044484   ;;  %vm522_vm6 = vcmask 1045509  }
  0x81   : > { %v484_v2 = vadd.f32 %v483_v61, %v482_v53  ;;  %v491_v3 = vadd.f32 %v490_v62, %v489_v54  ;;  %v498_v4 = vadd.f32 %v497_v63, %v496_v55  ;;  %v517_v5 = vsel %vm516_vm3, %v470_v59, %v515_v1 }
  0x82   : > { %v505_v6 = vadd.f32 %v504_v0, %v503_v56  ;;  %v519_v7 = vsel %vm518_vm4, %v477_v60, %v517_v5  ;;  %vm524_vm7 = vcmask 1046534   ;;  %vm526_vm8 = vcmask 1047559  }
  0x83   : > { %v521_v8 = vsel %vm520_vm5, %v484_v2, %v519_v7 }
  0x84   : > { %v523_v10 = vsel %vm522_vm6, %v491_v3, %v521_v8 }
  0x85   : > { %v525_v11 = vsel %vm524_vm7, %v498_v4, %v523_v10  ;;  %534 = sbr.rel (%p876_p0) target bundleno = 701 (0x2bd), region = 84 }
  0x86   : > { %v527_v12 = vsel %vm526_vm8, %v505_v6, %v525_v11 }
  0x87   : > { %v529_v13 = vadd.f32 %v527_v12, %v432_v9 }
  0x89   : > { %530 = vst.msk [vmem:[#allocation2] sm:$0xff] %vm449_vm1, %v529_v13 }
  0x8a   : > { %v1054_v14 = vld [vmem:[#allocation9 + $0x8] sm:$0xff]   ;;  %v1291_v15 = vmov 0.0   ;;  %v1055_v16 = vld [vmem:[#allocation9] sm:$0xff]   ;;  %vm1292_vm9 = vmmov 0   ;;  %v1058_v21 = vld [vmem:[#allocation10 + $0x8] sm:$0xff]   ;;  %v745_v47 = vstv %s744_s19 }
  0x8b   : > { %921 = vmatprep.subr.bf16.mxu0 %v1291_v15  ;;  %929 = vmatprep.subr.bf16.mxu1 %v1291_v15  ;;  %v1056_v19 = vld [vmem:[#allocation12 + $0x8] sm:$0xff]   ;;  %v1057_v20 = vld [vmem:[#allocation12] sm:$0xff]   ;;  %v609_v22 = vld [vmem:[#allocation7] sm:$0xf] }
  0x8c   : > { %922 = vmatpush3.bf16.msra.mxu0 %v1054_v14  ;;  %925 = vmatprep.mubr.msk.bf16.mxu0 %vm1292_vm9, %v1291_v15  ;;  %v1059_v23 = vld [vmem:[#allocation10] sm:$0xff]  }
  0x8d   : > { %923 = vmatprep.subr.bf16.mxu0 %v1291_v15  ;;  %933 = vmatprep.mubr.msk.bf16.mxu1 %vm1292_vm9, %v1291_v15  ;;  %v877_v24 = vld [vmem:[%s1555_s3] ss:$0 sm:$0xff] }
  0x8e   : > { %930 = vmatpush3.bf16.msra.mxu1 %v1056_v19  ;;  %v887_v37 = vld [vmem:[%s1558_s6] ss:$0 sm:$0xff] }
  0x8f   : > { %931 = vmatprep.subr.bf16.mxu1 %v1291_v15  ;;  %v888_v42 = vld [vmem:[%s1559_s7] ss:$0 sm:$0xff] }
  0x90   : > { %v535_v17 = vld [vmem:[#allocation2] sm:$0xff]  ;;  %924 = vmatpush3.bf16.msra.mxu0 %v1055_v16 }
  0x91   : > { %v536_v18 = vpack.c.bf16 %v535_v17, %v535_v17  ;;  %937 = vmatprep.subr.bf16.mxu0 %v1291_v15 }
  0x92   : > { %932 = vmatpush3.bf16.msra.mxu1 %v1057_v20 }
  0x93   : > { %926 = vmatmul.mubr.msk.bf16.vlgmr.msra.gmra.mxu0 %vm449_vm1, %v536_v18 }
  0x94   : > { %941 = vmatprep.mubr.msk.bf16.mxu0 %vm1292_vm9, %v1291_v15  ;;  %938 = vmatpush3.bf16.msra.mxu0 %v1058_v21 }
  0x95   : > { %934 = vmatmul.mubr.msk.bf16.vlgmr.msra.gmra.mxu1 %vm449_vm1, %v609_v22  ;;  %939 = vmatprep.subr.bf16.mxu0 %v1291_v15 }
  0x98   : > { %940 = vmatpush3.bf16.msra.mxu0 %v1059_v23 }
 0x153   : > { %v597_v25 = vpop.f32.mrf.mxu0 }
 0x154   : > { %v598_v26 = vadd.f32 %v877_v24, %v597_v25 }
 0x155   : > { %v927_v27 = vpop.f32.mrf.mxu0  ;;  %v663_v32 = vpop.f32.mrf.mxu1 }
 0x156   : > { %1060 = vtanh.f32 %v598_v26 }
 0x157   : > { %v600_v28 = vpop.f32.mrf.mxu0  ;;  %v935_v33 = vpop.f32.mrf.mxu1 }
 0x159   : > { %v928_v29 = vpop.f32.mrf.mxu0  ;;  %v666_v34 = vpop.f32.mrf.mxu1 }
 0x15b   : > { %v936_v35 = vpop.f32.mrf.mxu1 }
 0x163   : > { %v1061_v30 = vpop.eup %1060 }
 0x164   : > { %v604_v31 = vpack.c.bf16 %v1061_v30, %v1061_v30 }
 0x166   : > { %942 = vmatmul.mubr.msk.bf16.vlgmr.msra.gmra.mxu0 %vm449_vm1, %v604_v31 }
 0x226   : > { %v718_v36 = vpop.f32.mrf.mxu0 }
 0x227   : > { %v719_v38 = vadd.f32 %v718_v36, %v663_v32 }
 0x228   : > { %v943_v39 = vpop.f32.mrf.mxu0 }
 0x229   : > { %v731_v40 = vadd.f32 %v887_v37, %v719_v38 }
 0x22a   : > { %v721_v41 = vpop.f32.mrf.mxu0 }
 0x22b   : > { %v732_v43 = vmax.f32 %v731_v40, 0.0 }
 0x22c   : > { %v944_v44 = vpop.f32.mrf.mxu0 }
 0x22d   : > { %v740_v45 = vmul.f32 %v888_v42, %v732_v43 }
 0x22f   : > { %v741_v46 = vsel %vm449_vm1, %v740_v45, 0.0 }
 0x230   : > { %742 = vadd.xlane.f32.xlu0 %v741_v46 }
 0x2b9   : > { %v743_v48 = vpop.xlane.xlu0 %742 }
 0x2ba   : > { %v746_v49 = vadd.f32 %v745_v47, %v743_v48 }
 0x2bc   : > { %747 = vst [vmem:[#allocation13] sm:$0xff] %v746_v49 }
 0x2bd PF: > { %s1583_s10 = sadd.s32 4294967295, %s1280_s16   ;;  %s1293_s26 = smov [#allocation13]  }
 0x2be   : > { %p1519_p7 = scmp.eq.s32.totalorder %s1583_s10, 1  ;;  %s757_s23 = sshll.u32 %s1293_s26, 4  ;;  %s758_s23 = int_to_ptr.vmem [resolvable:$true] %s757_s23 }
 0x2bf   : > { %s1194_s27 = scalar_lea.vmem %s758_s23, 128  ;;  %p1201_p9 = scmp.lt.s32.totalorder %s758_s23, %s758_s23 }
 0x2c0   : > { %p1195_p2 = scmp.ne.s32.totalorder %s758_s23, %s1194_s27  ;;  %p1202_p10 = scmp.lt.s32.totalorder %s1194_s27, %s1194_s27 }
 0x2c2   : > { %p1196_p3 = pnand %p1195_p2, %p1519_p7  ;;  %p1203_p11 = por %p1202_p10, %p1201_p9 }
 0x2c4   : > { %p1197_p6 = pneg %p1196_p3 }
 0x2c6   : > { %p1204_p12 = pnand %p1203_p11, %p1197_p6 }
 0x2c8   : > { %1207 = shalt.err (!%p1204_p12)
}
 0x2c9   : > { %964 = dma.vmem_to_hbm [thread:$0]  (%p1519_p7), %s758_s23, 128, %s1561_s9, [#allocation6]  }
 0x2ca   : > { %1255 = dma.done.wait (%p1519_p7), [#allocation6], 128  }
 0x2cb   : > { %1257 = vsyncadd (%p1519_p7), [#allocation6], 4294967168 }
 0x2cc PF: > { %s26_s16 = sadd.s32 1, %s1280_s16   ;;  %s1585_s11 = smov %s1264_s12 }
 0x2cd   : > { %p23_p8 = scmp.ge.s32.totalorder %s26_s16, 4   ;;  %s1586_s12 = smov %s1268_s13 }
 0x2ce   : > { %s1587_s13 = smov %s1459_s24  ;;  %s1588_s14 = smov %s1276_s15 }
 0x2cf   : > { %s1589_s15 = smov %s1591_s20  ;;  %25 = sbr.rel (!%p23_p8) target bundleno = 11 (0xb), region = 119 }
 0x2d4   :  { %770 = vsyncpa [#allocation5], 1 }
 0x2d5   :  { %772 = vsyncpa [#allocation5 + $0x1], 1 }
 0x2d6   :  { %773 = vsyncpa [#allocation8], 1 }
 0x2d7   :  { %774 = vsyncpa [#allocation11], 1 }
 0x2d8   :  { %775 = vsyncpa [#allocation6], 1 }
 0x2d9   :  { %777 = vsyncpa [#allocation6 + $0x1], 1 }

</bundles_post_ra>
